<compile_context>
chip_gen: v5e
topology: v5e:2x2
jax: 0.10.0
libtpu: 0.0.40
codegen_flags: <defaults>
</compile_context>

<pallas_src>
import functools

import jax
import jax.numpy as jnp
from jax.experimental import pallas as pl
from jax.experimental.pallas import tpu as pltpu

EPS = 1e-5
LANE = 128


# --------------------------------------------------------------- kernel 1 ---
def pool_kernel(x_ref, out_ref):
    """AxisPool: channel max / channel mean.  x_ref: (1, C, TP) -> (1, 2, TP)."""
    x = x_ref[...]
    out_ref[:, 0:1, :] = jnp.max(x, axis=1, keepdims=True)
    out_ref[:, 1:2, :] = jnp.mean(x, axis=1, keepdims=True)


# --------------------------------------------------------------- kernel 2 ---
def conv_bn_sigmoid_kernel(pooled_ref, w_ref, gamma_ref, beta_ref, scale_ref):
    """2->1 KxK conv (input already circularly padded) + BatchNorm2d batch
    statistics + sigmoid, on the small VMEM-resident pooled map.

    pooled_ref : (N, 2, Hp, Wp)  VMEM
    w_ref      : (2*K*K,)        SMEM, (c, kh, kw) order
    gamma_ref  : (1,)            SMEM
    beta_ref   : (1,)            SMEM
    scale_ref  : (N, H, W)       VMEM out
    """
    n, cin, hp, wp = pooled_ref.shape
    _, h, w = scale_ref.shape
    kh_n = hp - h + 1
    kw_n = wp - w + 1

    pooled = pooled_ref[...]

    # Conv as a weighted sum over the 2*K*K taps (static slices, VPU FMAs) —
    # no im2col expansion, no lane-sparse MXU matmul.
    y = jnp.zeros((n, h, w), dtype=jnp.float32)
    t = 0
    for c in range(cin):
        for kh in range(kh_n):
            for kw in range(kw_n):
                y = y + w_ref[t] * pooled[:, c, kh:kh + h, kw:kw + w]
                t += 1

    # BatchNorm2d (training mode): biased batch stats over all N*H*W elements
    # of the single output channel; affine folded into one scale/shift.
    m = float(n * h * w)
    mean = jnp.sum(y) / m
    cen = y - mean
    var = jnp.sum(cen * cen) / m
    a = gamma_ref[0] * jax.lax.rsqrt(var + EPS)
    b = beta_ref[0] - mean * a
    z = y * a + b

    scale_ref[...] = 1.0 / (1.0 + jnp.exp(-z))


# --------------------------------------------------------------- kernel 3 ---
def apply_scale_kernel(x_ref, s_ref, out_ref):
    """out = x * scale, scale broadcast over channels.  Blocks (1,C,TP)/(1,1,TP)."""
    out_ref[...] = x_ref[...] * s_ref[...]


# ----------------------------------------------------------------- wrapper --
def _pick_spatial_tile(p_pad, max_tile=2048):
    """Largest multiple of 128 that divides p_pad and is <= max_tile."""
    t = min(p_pad, max_tile)
    t -= t % LANE
    while t >= LANE:
        if p_pad % t == 0:
            return t
        t -= LANE
    return p_pad


@functools.partial(jax.jit, static_argnames=("kernel_size",))
def attention_gate_forward(x, weight, gamma, beta, *, kernel_size):
    """Forward of AttentionGate(kernel_size).

    x      : (N, C, H, W)  float32
    weight : (1, 2, K, K)  float32  (BasicConv.conv weight, PyTorch layout)
    gamma  : (1,)          float32  (BatchNorm2d weight)
    beta   : (1,)          float32  (BatchNorm2d bias)
    Returns (N, C, H, W) float32.
    """
    n, c, h, w = x.shape
    k = kernel_size
    pad = (k - 1) // 2
    p = h * w

    x = x.astype(jnp.float32)

    # Flatten spatial to a lane-dense last axis (contiguous reshape, no copy;
    # zero-pad P to a multiple of 128 only if needed and slice back at the end).
    p_pad = ((p + LANE - 1) // LANE) * LANE
    x_flat = x.reshape(n, c, p)
    if p_pad != p:
        x_flat = jnp.pad(x_flat, ((0, 0), (0, 0), (0, p_pad - p)))

    tp = _pick_spatial_tile(p_pad)
    grid = (n, p_pad // tp)
    par = pltpu.CompilerParams(dimension_semantics=("parallel", "parallel"))

    # ---- kernel 1: AxisPool (channel max / mean), lane-dense & pipelined ----
    pooled_flat = pl.pallas_call(
        pool_kernel,
        out_shape=jax.ShapeDtypeStruct((n, 2, p_pad), jnp.float32),
        grid=grid,
        in_specs=[pl.BlockSpec((1, c, tp), lambda i, j: (i, 0, j))],
        out_specs=pl.BlockSpec((1, 2, tp), lambda i, j: (i, 0, j)),
        compiler_params=par,
    )(x_flat)

    # ---- glue: circular padding of the tiny pooled map ----------------------
    pooled = pooled_flat[:, :, :p].reshape(n, 2, h, w)
    if pad > 0:
        pooled = jnp.pad(pooled, ((0, 0), (0, 0), (pad, pad), (pad, pad)),
                         mode="wrap")

    w_flat = weight.reshape(2 * k * k).astype(jnp.float32)    # (c, kh, kw) order
    gamma1 = gamma.reshape(1).astype(jnp.float32)
    beta1 = beta.reshape(1).astype(jnp.float32)

    # ---- kernel 2: conv(2->1) + BN(batch stats) + sigmoid --------------------
    # TODO(synk): BatchNorm running-stats update (momentum=0.01) is a training
    # side effect that does not change the forward output; not emitted.
    scale_map = pl.pallas_call(
        conv_bn_sigmoid_kernel,
        out_shape=jax.ShapeDtypeStruct((n, h, w), jnp.float32),
        in_specs=[
            pl.BlockSpec(memory_space=pltpu.MemorySpace.VMEM),
            pl.BlockSpec(memory_space=pltpu.MemorySpace.SMEM),
            pl.BlockSpec(memory_space=pltpu.MemorySpace.SMEM),
            pl.BlockSpec(memory_space=pltpu.MemorySpace.SMEM),
        ],
        out_specs=pl.BlockSpec(memory_space=pltpu.MemorySpace.VMEM),
    )(pooled, w_flat, gamma1, beta1)

    scale_flat = scale_map.reshape(n, 1, p)
    if p_pad != p:
        scale_flat = jnp.pad(scale_flat, ((0, 0), (0, 0), (0, p_pad - p)))

    # ---- kernel 3: out = x * sigmoid(bn(conv(pool(x)))) ----------------------
    out_flat = pl.pallas_call(
        apply_scale_kernel,
        out_shape=jax.ShapeDtypeStruct((n, c, p_pad), jnp.float32),
        grid=grid,
        in_specs=[
            pl.BlockSpec((1, c, tp), lambda i, j: (i, 0, j)),
            pl.BlockSpec((1, 1, tp), lambda i, j: (i, 0, j)),
        ],
        out_specs=pl.BlockSpec((1, c, tp), lambda i, j: (i, 0, j)),
        compiler_params=par,
    )(x_flat, scale_flat)

    return out_flat[:, :, :p].reshape(n, c, h, w)


# -------------------------------------------------------------- reference ---
def _reference(x, weight, gamma, beta, kernel_size):
    k = kernel_size
    pad = (k - 1) // 2
    mx = jnp.max(x, axis=1, keepdims=True)
    mn = jnp.mean(x, axis=1, keepdims=True)
    xc = jnp.concatenate([mx, mn], axis=1)
    if pad > 0:
        xc = jnp.pad(xc, ((0, 0), (0, 0), (pad, pad), (pad, pad)), mode="wrap")
    y = jax.lax.conv_general_dilated(
        xc, weight, window_strides=(1, 1), padding="VALID",
        dimension_numbers=("NCHW", "OIHW", "NCHW"))
    mean = jnp.mean(y)
    var = jnp.mean((y - mean) ** 2)
    y = gamma.reshape(1, 1, 1, 1) * (y - mean) * jax.lax.rsqrt(var + EPS) \
        + beta.reshape(1, 1, 1, 1)
    return x * (1.0 / (1.0 + jnp.exp(-y)))


if __name__ == "__main__":
    key = jax.random.PRNGKey(0)
    k_x, k_w = jax.random.split(key)

    N, C, H, W = 2, 4, 16, 16
    K = 3                                   # AttentionGate(kernel_size=3)

    x = jax.random.normal(k_x, (N, C, H, W), dtype=jnp.float32)
    weight = jax.random.normal(k_w, (1, 2, K, K), dtype=jnp.float32) * 0.1
    gamma = jnp.ones((1,), dtype=jnp.float32)    # BatchNorm2d weight init
    beta = jnp.zeros((1,), dtype=jnp.float32)    # BatchNorm2d bias init

    out = attention_gate_forward(x, weight, gamma, beta, kernel_size=K)
    jax.block_until_ready(out)

    ref = _reference(x, weight, gamma, beta, K)
    assert out.shape == (N, C, H, W), out.shape
    assert jnp.allclose(out, ref, rtol=1e-4, atol=1e-4), \
        float(jnp.max(jnp.abs(out - ref)))
    print("KERNEL_OK")
</pallas_src>

<mosaic_0001>
module attributes {stable_mosaic.version = 11 : i64} {
  func.func @pool_kernel(%arg0: i32, %arg1: i32, %arg2: memref<1x4x256xf32, #tpu.memory_space<vmem>>, %arg3: memref<1x2x256xf32, #tpu.memory_space<vmem>>) attributes {dimension_semantics = [#tpu.dimension_semantics<parallel>, #tpu.dimension_semantics<parallel>], iteration_bounds = array<i64: 2, 1>, scalar_prefetch = 0 : i64, scratch_operands = 0 : i64, tpu.core_type = #tpu.core_type<tc>, window_params = [{transform_indices = @transform_0, window_bounds = array<i64: 1, 4, 256>}, {transform_indices = @transform_1, window_bounds = array<i64: 1, 2, 256>}]} {
    %c0 = arith.constant 0 : index
    %c0_0 = arith.constant 0 : index
    %c0_1 = arith.constant 0 : index
    %0 = vector.load %arg2[%c0, %c0_0, %c0_1] : memref<1x4x256xf32, #tpu.memory_space<vmem>>, vector<1x4x256xf32>
    %cst = arith.constant dense<0xFF800000> : vector<1x256xf32>
    %1 = vector.multi_reduction <maximumf>, %0, %cst [1] : vector<1x4x256xf32> to vector<1x256xf32>
    %2 = vector.shape_cast %1 : vector<1x256xf32> to vector<1x1x256xf32>
    %c0_2 = arith.constant 0 : index
    %c0_3 = arith.constant 0 : index
    %c0_4 = arith.constant 0 : index
    %3 = vector.load %arg3[%c0_2, %c0_3, %c0_4] : memref<1x2x256xf32, #tpu.memory_space<vmem>>, vector<1x1x256xf32>
    tpu.vector_store %arg3[%c0_2, %c0_3, %c0_4], %2 {strides = array<i32>} : memref<1x2x256xf32, #tpu.memory_space<vmem>>, vector<1x1x256xf32>,
    %cst_5 = arith.constant dense<0.000000e+00> : vector<1x256xf32>
    %4 = vector.multi_reduction <add>, %0, %cst_5 [1] : vector<1x4x256xf32> to vector<1x256xf32>
    %5 = vector.shape_cast %4 : vector<1x256xf32> to vector<1x1x256xf32>
    %cst_6 = arith.constant 4.000000e+00 : f32
    %6 = vector.broadcast %cst_6 : f32 to vector<1x1x256xf32>
    %7 = arith.divf %5, %6 : vector<1x1x256xf32>
    %c0_7 = arith.constant 0 : index
    %c1 = arith.constant 1 : index
    %c0_8 = arith.constant 0 : index
    %8 = vector.load %arg3[%c0_7, %c1, %c0_8] : memref<1x2x256xf32, #tpu.memory_space<vmem>>, vector<1x1x256xf32>
    tpu.vector_store %arg3[%c0_7, %c1, %c0_8], %7 {strides = array<i32>} : memref<1x2x256xf32, #tpu.memory_space<vmem>>, vector<1x1x256xf32>,
    return
  }
  func.func @transform_0(%arg0: i32, %arg1: i32) -> (i32, i32, i32) {
    %c0_i32 = arith.constant 0 : i32
    %c0_i32_0 = arith.constant 0 : i32
    return %arg0, %c0_i32, %arg1 : i32, i32, i32
  }
  func.func @transform_1(%arg0: i32, %arg1: i32) -> (i32, i32, i32) {
    %c0_i32 = arith.constant 0 : i32
    %c0_i32_0 = arith.constant 0 : i32
    return %arg0, %c0_i32, %arg1 : i32, i32, i32
  }
}

module attributes {stable_mosaic.version = 11 : i64} {
  func.func @conv_bn_sigmoid_kernel(%arg0: memref<2x2x18x18xf32, #tpu.memory_space<vmem>>, %arg1: memref<18xf32, #tpu.memory_space<smem>>, %arg2: memref<1xf32, #tpu.memory_space<smem>>, %arg3: memref<1xf32, #tpu.memory_space<smem>>, %arg4: memref<2x16x16xf32, #tpu.memory_space<vmem>>) attributes {dimension_semantics = [], scalar_prefetch = 0 : i64, scratch_operands = 0 : i64, tpu.core_type = #tpu.core_type<tc>} {
    %c0 = arith.constant 0 : index
    %c0_0 = arith.constant 0 : index
    %c0_1 = arith.constant 0 : index
    %c0_2 = arith.constant 0 : index
    %0 = vector.load %arg0[%c0, %c0_0, %c0_1, %c0_2] : memref<2x2x18x18xf32, #tpu.memory_space<vmem>>, vector<2x2x18x18xf32>
    %cst = arith.constant 0.000000e+00 : f32
    %1 = vector.broadcast %cst : f32 to vector<2x16x16xf32>
    %c0_3 = arith.constant 0 : index
    %2 = memref.load %arg1[%c0_3] : memref<18xf32, #tpu.memory_space<smem>>
    %3 = vector.extract_strided_slice %0 {offsets = [0, 0, 0, 0], sizes = [2, 1, 16, 16], strides = [1, 1, 1, 1]} : vector<2x2x18x18xf32> to vector<2x1x16x16xf32>
    %4 = vector.shape_cast %3 : vector<2x1x16x16xf32> to vector<2x16x16xf32>
    %5 = vector.broadcast %2 : f32 to vector<2x16x16xf32>
    %6 = arith.mulf %5, %4 : vector<2x16x16xf32>
    %7 = arith.addf %1, %6 : vector<2x16x16xf32>
    %c1 = arith.constant 1 : index
    %8 = memref.load %arg1[%c1] : memref<18xf32, #tpu.memory_space<smem>>
    %9 = vector.extract_strided_slice %0 {offsets = [0, 0, 0, 1], sizes = [2, 1, 16, 16], strides = [1, 1, 1, 1]} : vector<2x2x18x18xf32> to vector<2x1x16x16xf32>
    %10 = vector.shape_cast %9 : vector<2x1x16x16xf32> to vector<2x16x16xf32>
    %11 = vector.broadcast %8 : f32 to vector<2x16x16xf32>
    %12 = arith.mulf %11, %10 : vector<2x16x16xf32>
    %13 = arith.addf %7, %12 : vector<2x16x16xf32>
    %c2 = arith.constant 2 : index
    %14 = memref.load %arg1[%c2] : memref<18xf32, #tpu.memory_space<smem>>
    %15 = vector.extract_strided_slice %0 {offsets = [0, 0, 0, 2], sizes = [2, 1, 16, 16], strides = [1, 1, 1, 1]} : vector<2x2x18x18xf32> to vector<2x1x16x16xf32>
    %16 = vector.shape_cast %15 : vector<2x1x16x16xf32> to vector<2x16x16xf32>
    %17 = vector.broadcast %14 : f32 to vector<2x16x16xf32>
    %18 = arith.mulf %17, %16 : vector<2x16x16xf32>
    %19 = arith.addf %13, %18 : vector<2x16x16xf32>
    %c3 = arith.constant 3 : index
    %20 = memref.load %arg1[%c3] : memref<18xf32, #tpu.memory_space<smem>>
    %21 = vector.extract_strided_slice %0 {offsets = [0, 0, 1, 0], sizes = [2, 1, 16, 16], strides = [1, 1, 1, 1]} : vector<2x2x18x18xf32> to vector<2x1x16x16xf32>
    %22 = vector.shape_cast %21 : vector<2x1x16x16xf32> to vector<2x16x16xf32>
    %23 = vector.broadcast %20 : f32 to vector<2x16x16xf32>
    %24 = arith.mulf %23, %22 : vector<2x16x16xf32>
    %25 = arith.addf %19, %24 : vector<2x16x16xf32>
    %c4 = arith.constant 4 : index
    %26 = memref.load %arg1[%c4] : memref<18xf32, #tpu.memory_space<smem>>
    %27 = vector.extract_strided_slice %0 {offsets = [0, 0, 1, 1], sizes = [2, 1, 16, 16], strides = [1, 1, 1, 1]} : vector<2x2x18x18xf32> to vector<2x1x16x16xf32>
    %28 = vector.shape_cast %27 : vector<2x1x16x16xf32> to vector<2x16x16xf32>
    %29 = vector.broadcast %26 : f32 to vector<2x16x16xf32>
    %30 = arith.mulf %29, %28 : vector<2x16x16xf32>
    %31 = arith.addf %25, %30 : vector<2x16x16xf32>
    %c5 = arith.constant 5 : index
    %32 = memref.load %arg1[%c5] : memref<18xf32, #tpu.memory_space<smem>>
    %33 = vector.extract_strided_slice %0 {offsets = [0, 0, 1, 2], sizes = [2, 1, 16, 16], strides = [1, 1, 1, 1]} : vector<2x2x18x18xf32> to vector<2x1x16x16xf32>
    %34 = vector.shape_cast %33 : vector<2x1x16x16xf32> to vector<2x16x16xf32>
    %35 = vector.broadcast %32 : f32 to vector<2x16x16xf32>
    %36 = arith.mulf %35, %34 : vector<2x16x16xf32>
    %37 = arith.addf %31, %36 : vector<2x16x16xf32>
    %c6 = arith.constant 6 : index
    %38 = memref.load %arg1[%c6] : memref<18xf32, #tpu.memory_space<smem>>
    %39 = vector.extract_strided_slice %0 {offsets = [0, 0, 2, 0], sizes = [2, 1, 16, 16], strides = [1, 1, 1, 1]} : vector<2x2x18x18xf32> to vector<2x1x16x16xf32>
    %40 = vector.shape_cast %39 : vector<2x1x16x16xf32> to vector<2x16x16xf32>
    %41 = vector.broadcast %38 : f32 to vector<2x16x16xf32>
    %42 = arith.mulf %41, %40 : vector<2x16x16xf32>
    %43 = arith.addf %37, %42 : vector<2x16x16xf32>
    %c7 = arith.constant 7 : index
    %44 = memref.load %arg1[%c7] : memref<18xf32, #tpu.memory_space<smem>>
    %45 = vector.extract_strided_slice %0 {offsets = [0, 0, 2, 1], sizes = [2, 1, 16, 16], strides = [1, 1, 1, 1]} : vector<2x2x18x18xf32> to vector<2x1x16x16xf32>
    %46 = vector.shape_cast %45 : vector<2x1x16x16xf32> to vector<2x16x16xf32>
    %47 = vector.broadcast %44 : f32 to vector<2x16x16xf32>
    %48 = arith.mulf %47, %46 : vector<2x16x16xf32>
    %49 = arith.addf %43, %48 : vector<2x16x16xf32>
    %c8 = arith.constant 8 : index
    %50 = memref.load %arg1[%c8] : memref<18xf32, #tpu.memory_space<smem>>
    %51 = vector.extract_strided_slice %0 {offsets = [0, 0, 2, 2], sizes = [2, 1, 16, 16], strides = [1, 1, 1, 1]} : vector<2x2x18x18xf32> to vector<2x1x16x16xf32>
    %52 = vector.shape_cast %51 : vector<2x1x16x16xf32> to vector<2x16x16xf32>
    %53 = vector.broadcast %50 : f32 to vector<2x16x16xf32>
    %54 = arith.mulf %53, %52 : vector<2x16x16xf32>
    %55 = arith.addf %49, %54 : vector<2x16x16xf32>
    %c9 = arith.constant 9 : index
    %56 = memref.load %arg1[%c9] : memref<18xf32, #tpu.memory_space<smem>>
    %57 = vector.extract_strided_slice %0 {offsets = [0, 1, 0, 0], sizes = [2, 1, 16, 16], strides = [1, 1, 1, 1]} : vector<2x2x18x18xf32> to vector<2x1x16x16xf32>
    %58 = vector.shape_cast %57 : vector<2x1x16x16xf32> to vector<2x16x16xf32>
    %59 = vector.broadcast %56 : f32 to vector<2x16x16xf32>
    %60 = arith.mulf %59, %58 : vector<2x16x16xf32>
    %61 = arith.addf %55, %60 : vector<2x16x16xf32>
    %c10 = arith.constant 10 : index
    %62 = memref.load %arg1[%c10] : memref<18xf32, #tpu.memory_space<smem>>
    %63 = vector.extract_strided_slice %0 {offsets = [0, 1, 0, 1], sizes = [2, 1, 16, 16], strides = [1, 1, 1, 1]} : vector<2x2x18x18xf32> to vector<2x1x16x16xf32>
    %64 = vector.shape_cast %63 : vector<2x1x16x16xf32> to vector<2x16x16xf32>
    %65 = vector.broadcast %62 : f32 to vector<2x16x16xf32>
    %66 = arith.mulf %65, %64 : vector<2x16x16xf32>
    %67 = arith.addf %61, %66 : vector<2x16x16xf32>
    %c11 = arith.constant 11 : index
    %68 = memref.load %arg1[%c11] : memref<18xf32, #tpu.memory_space<smem>>
    %69 = vector.extract_strided_slice %0 {offsets = [0, 1, 0, 2], sizes = [2, 1, 16, 16], strides = [1, 1, 1, 1]} : vector<2x2x18x18xf32> to vector<2x1x16x16xf32>
    %70 = vector.shape_cast %69 : vector<2x1x16x16xf32> to vector<2x16x16xf32>
    %71 = vector.broadcast %68 : f32 to vector<2x16x16xf32>
    %72 = arith.mulf %71, %70 : vector<2x16x16xf32>
    %73 = arith.addf %67, %72 : vector<2x16x16xf32>
    %c12 = arith.constant 12 : index
    %74 = memref.load %arg1[%c12] : memref<18xf32, #tpu.memory_space<smem>>
    %75 = vector.extract_strided_slice %0 {offsets = [0, 1, 1, 0], sizes = [2, 1, 16, 16], strides = [1, 1, 1, 1]} : vector<2x2x18x18xf32> to vector<2x1x16x16xf32>
    %76 = vector.shape_cast %75 : vector<2x1x16x16xf32> to vector<2x16x16xf32>
    %77 = vector.broadcast %74 : f32 to vector<2x16x16xf32>
    %78 = arith.mulf %77, %76 : vector<2x16x16xf32>
    %79 = arith.addf %73, %78 : vector<2x16x16xf32>
    %c13 = arith.constant 13 : index
    %80 = memref.load %arg1[%c13] : memref<18xf32, #tpu.memory_space<smem>>
    %81 = vector.extract_strided_slice %0 {offsets = [0, 1, 1, 1], sizes = [2, 1, 16, 16], strides = [1, 1, 1, 1]} : vector<2x2x18x18xf32> to vector<2x1x16x16xf32>
    %82 = vector.shape_cast %81 : vector<2x1x16x16xf32> to vector<2x16x16xf32>
    %83 = vector.broadcast %80 : f32 to vector<2x16x16xf32>
    %84 = arith.mulf %83, %82 : vector<2x16x16xf32>
    %85 = arith.addf %79, %84 : vector<2x16x16xf32>
    %c14 = arith.constant 14 : index
    %86 = memref.load %arg1[%c14] : memref<18xf32, #tpu.memory_space<smem>>
    %87 = vector.extract_strided_slice %0 {offsets = [0, 1, 1, 2], sizes = [2, 1, 16, 16], strides = [1, 1, 1, 1]} : vector<2x2x18x18xf32> to vector<2x1x16x16xf32>
    %88 = vector.shape_cast %87 : vector<2x1x16x16xf32> to vector<2x16x16xf32>
    %89 = vector.broadcast %86 : f32 to vector<2x16x16xf32>
    %90 = arith.mulf %89, %88 : vector<2x16x16xf32>
    %91 = arith.addf %85, %90 : vector<2x16x16xf32>
    %c15 = arith.constant 15 : index
    %92 = memref.load %arg1[%c15] : memref<18xf32, #tpu.memory_space<smem>>
    %93 = vector.extract_strided_slice %0 {offsets = [0, 1, 2, 0], sizes = [2, 1, 16, 16], strides = [1, 1, 1, 1]} : vector<2x2x18x18xf32> to vector<2x1x16x16xf32>
    %94 = vector.shape_cast %93 : vector<2x1x16x16xf32> to vector<2x16x16xf32>
    %95 = vector.broadcast %92 : f32 to vector<2x16x16xf32>
    %96 = arith.mulf %95, %94 : vector<2x16x16xf32>
    %97 = arith.addf %91, %96 : vector<2x16x16xf32>
    %c16 = arith.constant 16 : index
    %98 = memref.load %arg1[%c16] : memref<18xf32, #tpu.memory_space<smem>>
    %99 = vector.extract_strided_slice %0 {offsets = [0, 1, 2, 1], sizes = [2, 1, 16, 16], strides = [1, 1, 1, 1]} : vector<2x2x18x18xf32> to vector<2x1x16x16xf32>
    %100 = vector.shape_cast %99 : vector<2x1x16x16xf32> to vector<2x16x16xf32>
    %101 = vector.broadcast %98 : f32 to vector<2x16x16xf32>
    %102 = arith.mulf %101, %100 : vector<2x16x16xf32>
    %103 = arith.addf %97, %102 : vector<2x16x16xf32>
    %c17 = arith.constant 17 : index
    %104 = memref.load %arg1[%c17] : memref<18xf32, #tpu.memory_space<smem>>
    %105 = vector.extract_strided_slice %0 {offsets = [0, 1, 2, 2], sizes = [2, 1, 16, 16], strides = [1, 1, 1, 1]} : vector<2x2x18x18xf32> to vector<2x1x16x16xf32>
    %106 = vector.shape_cast %105 : vector<2x1x16x16xf32> to vector<2x16x16xf32>
    %107 = vector.broadcast %104 : f32 to vector<2x16x16xf32>
    %108 = arith.mulf %107, %106 : vector<2x16x16xf32>
    %109 = arith.addf %103, %108 : vector<2x16x16xf32>
    %110 = vector.shape_cast %109 : vector<2x16x16xf32> to vector<1x2x16x16xf32>
    %cst_4 = arith.constant dense<0.000000e+00> : vector<1xf32>
    %111 = vector.multi_reduction <add>, %110, %cst_4 [1, 2, 3] : vector<1x2x16x16xf32> to vector<1xf32>
    %112 = vector.shape_cast %111 : vector<1xf32> to vector<1x1x1x1xf32>
    %113 = vector.extract %112[0, 0, 0, 0] : f32 from vector<1x1x1x1xf32>
    %cst_5 = arith.constant 5.120000e+02 : f32
    %114 = arith.divf %113, %cst_5 : f32
    %115 = vector.broadcast %114 : f32 to vector<2x16x16xf32>
    %116 = arith.subf %109, %115 : vector<2x16x16xf32>
    %117 = arith.mulf %116, %116 : vector<2x16x16xf32>
    %118 = vector.shape_cast %117 : vector<2x16x16xf32> to vector<1x2x16x16xf32>
    %cst_6 = arith.constant dense<0.000000e+00> : vector<1xf32>
    %119 = vector.multi_reduction <add>, %118, %cst_6 [1, 2, 3] : vector<1x2x16x16xf32> to vector<1xf32>
    %120 = vector.shape_cast %119 : vector<1xf32> to vector<1x1x1x1xf32>
    %121 = vector.extract %120[0, 0, 0, 0] : f32 from vector<1x1x1x1xf32>
    %cst_7 = arith.constant 5.120000e+02 : f32
    %122 = arith.divf %121, %cst_7 : f32
    %c0_8 = arith.constant 0 : index
    %123 = memref.load %arg2[%c0_8] : memref<1xf32, #tpu.memory_space<smem>>
    %cst_9 = arith.constant 9.99999974E-6 : f32
    %124 = arith.addf %122, %cst_9 : f32
    %125 = math.rsqrt %124 : f32
    %126 = arith.mulf %123, %125 : f32
    %c0_10 = arith.constant 0 : index
    %127 = memref.load %arg3[%c0_10] : memref<1xf32, #tpu.memory_space<smem>>
    %128 = arith.mulf %114, %126 : f32
    %129 = arith.subf %127, %128 : f32
    %130 = vector.broadcast %126 : f32 to vector<2x16x16xf32>
    %131 = arith.mulf %109, %130 : vector<2x16x16xf32>
    %132 = vector.broadcast %129 : f32 to vector<2x16x16xf32>
    %133 = arith.addf %131, %132 : vector<2x16x16xf32>
    %cst_11 = arith.constant 0.000000e+00 : f32
    %134 = vector.broadcast %cst_11 : f32 to vector<2x16x16xf32>
    %135 = arith.subf %134, %133 : vector<2x16x16xf32>
    %136 = math.exp %135 : vector<2x16x16xf32>
    %cst_12 = arith.constant 1.000000e+00 : f32
    %137 = vector.broadcast %cst_12 : f32 to vector<2x16x16xf32>
    %138 = arith.addf %137, %136 : vector<2x16x16xf32>
    %cst_13 = arith.constant 1.000000e+00 : f32
    %139 = vector.broadcast %cst_13 : f32 to vector<2x16x16xf32>
    %140 = arith.divf %139, %138 : vector<2x16x16xf32>
    %c0_14 = arith.constant 0 : index
    %c0_15 = arith.constant 0 : index
    %c0_16 = arith.constant 0 : index
    %141 = vector.load %arg4[%c0_14, %c0_15, %c0_16] : memref<2x16x16xf32, #tpu.memory_space<vmem>>, vector<2x16x16xf32>
    tpu.vector_store %arg4[%c0_14, %c0_15, %c0_16], %140 {strides = array<i32>} : memref<2x16x16xf32, #tpu.memory_space<vmem>>, vector<2x16x16xf32>,
    return
  }
}

module attributes {stable_mosaic.version = 11 : i64} {
  func.func @apply_scale_kernel(%arg0: i32, %arg1: i32, %arg2: memref<1x4x256xf32, #tpu.memory_space<vmem>>, %arg3: memref<1x1x256xf32, #tpu.memory_space<vmem>>, %arg4: memref<1x4x256xf32, #tpu.memory_space<vmem>>) attributes {dimension_semantics = [#tpu.dimension_semantics<parallel>, #tpu.dimension_semantics<parallel>], iteration_bounds = array<i64: 2, 1>, scalar_prefetch = 0 : i64, scratch_operands = 0 : i64, tpu.core_type = #tpu.core_type<tc>, window_params = [{transform_indices = @transform_0, window_bounds = array<i64: 1, 4, 256>}, {transform_indices = @transform_1, window_bounds = array<i64: 1, 1, 256>}, {transform_indices = @transform_2, window_bounds = array<i64: 1, 4, 256>}]} {
    %c0 = arith.constant 0 : index
    %c0_0 = arith.constant 0 : index
    %c0_1 = arith.constant 0 : index
    %0 = vector.load %arg2[%c0, %c0_0, %c0_1] : memref<1x4x256xf32, #tpu.memory_space<vmem>>, vector<1x4x256xf32>
    %c0_2 = arith.constant 0 : index
    %c0_3 = arith.constant 0 : index
    %c0_4 = arith.constant 0 : index
    %1 = vector.load %arg3[%c0_2, %c0_3, %c0_4] : memref<1x1x256xf32, #tpu.memory_space<vmem>>, vector<1x1x256xf32>
    %2 = vector.broadcast %1 : vector<1x1x256xf32> to vector<1x4x256xf32>
    %3 = arith.mulf %0, %2 : vector<1x4x256xf32>
    %c0_5 = arith.constant 0 : index
    %c0_6 = arith.constant 0 : index
    %c0_7 = arith.constant 0 : index
    %4 = vector.load %arg4[%c0_5, %c0_6, %c0_7] : memref<1x4x256xf32, #tpu.memory_space<vmem>>, vector<1x4x256xf32>
    tpu.vector_store %arg4[%c0_5, %c0_6, %c0_7], %3 {strides = array<i32>} : memref<1x4x256xf32, #tpu.memory_space<vmem>>, vector<1x4x256xf32>,
    return
  }
  func.func @transform_0(%arg0: i32, %arg1: i32) -> (i32, i32, i32) {
    %c0_i32 = arith.constant 0 : i32
    %c0_i32_0 = arith.constant 0 : i32
    return %arg0, %c0_i32, %arg1 : i32, i32, i32
  }
  func.func @transform_1(%arg0: i32, %arg1: i32) -> (i32, i32, i32) {
    %c0_i32 = arith.constant 0 : i32
    %c0_i32_0 = arith.constant 0 : i32
    return %arg0, %c0_i32, %arg1 : i32, i32, i32
  }
  func.func @transform_2(%arg0: i32, %arg1: i32) -> (i32, i32, i32) {
    %c0_i32 = arith.constant 0 : i32
    %c0_i32_0 = arith.constant 0 : i32
    return %arg0, %c0_i32, %arg1 : i32, i32, i32
  }
}

</mosaic_0001>

<bundles_post_ra>
// kernel: attention_gate_forward.3
= control target key start
LH: loop header
LB: loop body
LE: loop exit
PB: predicated region body
PF: predicated region fallthrough
CT: control target
= control target key end

     0   :  { %s387_s6 = smov 0   ;;  %s389_s7 = smov 0   ;;  %s438_s0 = inlined_call_operand.vmem [shape: f32[2,4,256], index: 0, kind: input, shape index: {}]   ;;  %s439_s1 = inlined_call_operand.vmem [shape: f32[2,2,256], index: 1, kind: output, shape index: {}]  }
   0x1   :  { %s391_s8 = smov 0  }
   0x2 LB: > { %s23_s9 = sadd.s32 1, %s370_s7  ;;  %p315_p0 = scmp.ge.s32.totalorder %s374_s8, 1  ;;  %s374_s8 = sphi %s391_s8, %s11_s8   ;;  %s370_s7 = sphi %s389_s7, %s443_s7   ;;  %s366_s6 = sphi %s387_s6, %s442_s6  }
   0x3   : > { %p25_p1 = scmp.ge.s32.totalorder %s23_s9, 2  ;;  %p108_p2 = scmp.lt.s32.totalorder %s374_s8, 3 }
   0x5   : > { %s445_s9 = smov (%p25_p1, %s23_s9), 0  ;;  %p109_p3 = pnand %p315_p0, %p108_p2 }
   0x6   : > { %p137_p4 = scmp.lt.s32.totalorder (!%p109_p3), %s366_s6, 1 }
   0x7   : > { %112 = sbr.rel (%p109_p3) target bundleno = 51 (0x33), region = 24 }
   0xc   : > { %s447_s6 = smov (!%p137_p4, %s366_s6), 1  ;;  %v376_v1 = vmov 4.0   ;;  %vm163_vm0 = vcmask 1043456   ;;  %v184_v21 = vlaneseq  ;;  %vm181_vm1 = vcmask 1040384  }
   0xd   : > { %s323_s10 = sshll.u32 %s447_s6, 3  ;;  %350 = vrcp.f32 %v376_v1  ;;  %s324_s14 = sshll.u32 %s447_s6, 2 }
   0xe   : > { %s144_s13 = scalar_lea.vmem %s438_s0, %s323_s10  ;;  %vm416_vm2 = vcmp.lt.s32.totalorder %v184_v21, 256  ;;  %s154_s17 = scalar_lea.vmem %s439_s1, %s324_s14 }
   0xf   : > { %v156_v0 = vld [vmem:[%s144_s13] sm:$0xff] }
  0x10   : > { %158 = vst [vmem:[#allocation1] ss:$2 sm:$0xff] %v156_v0 }
  0x13   : > { %v351_v2 = vpop.eup %350 }
  0x14   : > { %v209_v9 = vmul.f32 4.0, %v351_v2  ;;  %vm213_vm3 = vweird.f32 %v351_v2 }
  0x16   : > { %v210_v14 = vsub.f32 1.0, %v209_v9 }
  0x17   : > { %v159_v3 = vld.sshfl [vmem:[#allocation1] sm:$0xff pattern:$0x75316420]  ;;  %v160_v4 = vld.sshfl [vmem:[#allocation1 + $0x8] sm:$0xff pattern:$0x75316420] }
  0x18   : > { %v164_v5 = vsel %vm163_vm0, %v159_v3, -inf  ;;  %v171_v6 = vsel %vm163_vm0, %v160_v4, -inf  ;;  %189 = vst [vmem:[#allocation1] ss:$2 sm:$0xff] %v156_v0  ;;  %v211_v26 = vmul.f32 %v351_v2, %v210_v14 }
  0x19   : > { %v165_v7 = vrot.slane %v164_v5, 4  ;;  %v172_v8 = vrot.slane %v171_v6, 4 }
  0x1a   : > { %v212_v35 = vadd.f32 %v351_v2, %v211_v26 }
  0x1b   : > { %v166_v10 = vmax.f32 %v164_v5, %v165_v7  ;;  %v173_v11 = vmax.f32 %v171_v6, %v172_v8 }
  0x1c   : > { %v214_v41 = vsel %vm213_vm3, %v351_v2, %v212_v35 }
  0x1d   : > { %v167_v12 = vrot.slane %v166_v10, 2  ;;  %v174_v13 = vrot.slane %v173_v11, 2 }
  0x1f   : > { %v168_v15 = vmax.f32 %v166_v10, %v167_v12  ;;  %v175_v16 = vmax.f32 %v173_v11, %v174_v13  ;;  %v190_v17 = vld.sshfl [vmem:[#allocation1] sm:$0xff pattern:$0x75316420]  ;;  %v191_v18 = vld.sshfl [vmem:[#allocation1 + $0x8] sm:$0xff pattern:$0x75316420] }
  0x20   : > { %v194_v19 = vsel %vm163_vm0, %v190_v17, 0.0  ;;  %v201_v20 = vsel %vm163_vm0, %v191_v18, 0.0 }
  0x21   : > { %v195_v22 = vrot.slane %v194_v19, 4  ;;  %v202_v23 = vrot.slane %v201_v20, 4  ;;  %v169_v24 = vrot.slane %v168_v15, 1  ;;  %v176_v25 = vrot.slane %v175_v16, 1 }
  0x23   : > { %v177_v27 = vmax.f32 %v175_v16, %v176_v25  ;;  %v196_v28 = vadd.f32 %v195_v22, %v194_v19  ;;  %v203_v29 = vadd.f32 %v202_v23, %v201_v20  ;;  %v170_v31 = vmax.f32 %v168_v15, %v169_v24 }
  0x25   : > { %v180_v32 = vrot.slane %v177_v27, 7  ;;  %v197_v33 = vrot.slane %v196_v28, 2  ;;  %v204_v34 = vrot.slane %v203_v29, 2 }
  0x27   : > { %v182_v36 = vsel %vm181_vm1, %v170_v31, %v180_v32  ;;  %v198_v37 = vadd.f32 %v197_v33, %v196_v28  ;;  %v205_v38 = vadd.f32 %v204_v34, %v203_v29 }
  0x28   : > { %188 = vst.msk [vmem:[%s154_s17] ss:$2 sm:$0x3] %vm416_vm2, %v182_v36 }
  0x29   : > { %v199_v39 = vrot.slane %v198_v37, 1  ;;  %v206_v40 = vrot.slane %v205_v38, 1 }
  0x2b   : > { %v200_v42 = vadd.f32 %v199_v39, %v198_v37  ;;  %v207_v43 = vadd.f32 %v206_v40, %v205_v38 }
  0x2d   : > { %v216_v44 = vmul.f32 %v214_v41, %v207_v43  ;;  %v215_v45 = vmul.f32 %v214_v41, %v200_v42 }
  0x2f   : > { %v219_v46 = vrot.slane %v216_v44, 7 }
  0x31   : > { %v220_v47 = vsel %vm181_vm1, %v215_v45, %v219_v46 }
  0x32   : > { %320 = vst.msk [vmem:[%s154_s17 + $0x1] ss:$2 sm:$0x3] %vm416_vm2, %v220_v47 }
  0x33 PF: > { %s11_s8 = sadd.s32 1, %s374_s8   ;;  %s442_s6 = smov %s370_s7 }
  0x34   : > { %p8_p5 = scmp.ge.s32.totalorder %s11_s8, 4   ;;  %s443_s7 = smov %s445_s9 }
  0x36   :  { %10 = sbr.rel (!%p8_p5) target bundleno = 2 (0x2), region = 55 }

// kernel: attention_gate_forward.5
= control target key start
LH: loop header
LB: loop body
LE: loop exit
PB: predicated region body
PF: predicated region fallthrough
CT: control target
= control target key end

     0   :  { %s406_s9 = smov 0   ;;  %s408_s10 = smov 0   ;;  %s435_s0 = inlined_call_operand.vmem [shape: f32[2,4,256], index: 0, kind: input, shape index: {}]   ;;  %s436_s1 = inlined_call_operand.vmem [shape: f32[2,1,256], index: 1, kind: input, shape index: {}]   ;;  %s437_s2 = inlined_call_operand.vmem [shape: f32[2,4,256], index: 2, kind: output, shape index: {}]  }
   0x1   :  { %s410_s11 = smov 0  }
   0x2 LB: > { %s24_s12 = sadd.s32 1, %s385_s10  ;;  %p333_p0 = scmp.ge.s32.totalorder %s389_s11, 1  ;;  %s389_s11 = sphi %s410_s11, %s12_s11   ;;  %s385_s10 = sphi %s408_s10, %s439_s10   ;;  %s381_s9 = sphi %s406_s9, %s438_s9  }
   0x3   : > { %p26_p1 = scmp.ge.s32.totalorder %s24_s12, 2  ;;  %p149_p2 = scmp.lt.s32.totalorder %s389_s11, 3 }
   0x5   : > { %s441_s12 = smov (%p26_p1, %s24_s12), 0  ;;  %p150_p3 = pnand %p333_p0, %p149_p2 }
   0x6   : > { %p188_p4 = scmp.lt.s32.totalorder (!%p150_p3), %s381_s9, 1 }
   0x7   : > { %153 = sbr.rel (%p150_p3) target bundleno = 24 (0x18), region = 28 }
   0xc   : > { %s443_s9 = smov (!%p188_p4, %s381_s9), 1  ;;  %vm222_vm0 = vcmask 1043456  }
   0xd   : > { %s341_s13 = sshll.u32 %s443_s9, 3  ;;  %s336_s14 = sshll.u32 %s443_s9, 1 }
   0xe   : > { %s204_s17 = scalar_lea.vmem %s436_s1, %s336_s14  ;;  %s195_s20 = scalar_lea.vmem %s435_s0, %s341_s13 }
   0xf   : > { %v217_v0 = vld [vmem:[%s204_s17] sm:$0x3]  ;;  %s214_s23 = scalar_lea.vmem %s437_s2, %s341_s13 }
  0x10   : > { %v219_v1 = vperm.slane %v217_v0, 0  ;;  %v220_v2 = vperm.slane %v217_v0, 1  ;;  %v216_v3 = vld [vmem:[%s195_s20] sm:$0xff] }
  0x12   : > { %v221_v4 = vrot.slane %v220_v2, 4 }
  0x14   : > { %v223_v5 = vsel %vm222_vm0, %v219_v1, %v221_v4 }
  0x15   : > { %v225_v6 = vmul.f32 %v223_v5, %v216_v3 }
  0x17   : > { %226 = vst [vmem:[%s214_s23] sm:$0xff] %v225_v6 }
  0x18 PF: > { %s12_s11 = sadd.s32 1, %s389_s11   ;;  %s438_s9 = smov %s385_s10 }
  0x19   : > { %p9_p5 = scmp.ge.s32.totalorder %s12_s11, 4   ;;  %s439_s10 = smov %s441_s12 }
  0x1b   :  { %11 = sbr.rel (!%p9_p5) target bundleno = 2 (0x2), region = 61 }

// kernel: attention_gate_forward.4
= control target key start
LH: loop header
LB: loop body
LE: loop exit
PB: predicated region body
PF: predicated region fallthrough
CT: control target
= control target key end

     0   :  { %11 = vsyncpa [#allocation5], 0  ;;  %s854_s18 = smov [#allocation4]   ;;  %s1250_s0 = inlined_call_operand.vmem [shape: f32[2,2,18,18], index: 0, kind: input, shape index: {}]   ;;  %s1251_s1 = inlined_call_operand.vmem [shape: f32[18], index: 1, kind: input, shape index: {}]   ;;  %s1252_s2 = inlined_call_operand.<no memory space> [shape: f32[1], index: 2, kind: input, shape index: {}]   ;;  %s1253_s3 = inlined_call_operand.<no memory space> [shape: f32[1], index: 3, kind: input, shape index: {}]   ;;  %s1254_s4 = inlined_call_operand.vmem [shape: f32[2,16,16], index: 4, kind: output, shape index: {}]  }
   0x1   :  { %s19_s17 = sshll.u32 %s1251_s1, 4  ;;  %s20_s17 = int_to_ptr.vmem [resolvable:$true] %s19_s17 }
   0x2   :  { %22 = dma.vmem_to_smem %s20_s17, 16, %s854_s18, [#allocation5]  }
   0x3   :  { %852 = dma.done.wait [#allocation5], 16  }
   0x4   :  { %853 = vsyncadd [#allocation5], 4294967280 }
   0x5   :  { %31 = sfence }
   0x6   :  { %s791_s19 = sld [smem:[#allocation4 + $0x1]]  ;;  %v889_v0 = vld [vmem:[%s1250_s0 + $0x30] sm:$0xff]  ;;  %v894_v1 = vld [vmem:[%s1250_s0] sm:$0xff]  ;;  %v901_v6 = vld [vmem:[%s1250_s0 + $0x8] sm:$0xff]  ;;  %s855_s27 = smov 127   ;;  %vm120_vm0 = vcmask 1046528  }
   0x7   :  { %s792_s20 = sld [smem:[#allocation4 + $0x2]]  ;;  %s856_s28 = smov 126   ;;  %v912_v10 = vld [vmem:[%s1250_s0 + $0x38] sm:$0xff]  ;;  %v923_v15 = vld [vmem:[%s1250_s0 + $0x10] sm:$0x3]  ;;  %vm233_vm1 = vcmask 1045504  }
   0x8   :  { %s794_s1 = sld [smem:[#allocation4 + $0x4]]  ;;  %v939_v30 = vld [vmem:[%s1250_s0 + $0x40] sm:$0x3]  ;;  %vm618_vm2 = vcmask 130048  }
   0x9   :  { %s795_s5 = sld [smem:[#allocation4 + $0x5]] }
   0xa   :  { %s797_s10 = sld [smem:[#allocation4 + $0x7]] }
   0xb   :  { %s798_s11 = sld [smem:[#allocation4 + $0x8]] }
   0xc   :  { %v55_v2 = vstv %s791_s19  ;;  %s800_s12 = sld [smem:[#allocation4 + $0xa]] }
   0xd   :  { %v58_v3 = vmul.f32 %v55_v2, %v889_v0  ;;  %v56_v4 = vmul.f32 %v55_v2, %v894_v1  ;;  %v81_v5 = vstv %s792_s20  ;;  %v57_v9 = vmul.f32 %v55_v2, %v901_v6  ;;  %s801_s17 = sld [smem:[#allocation4 + $0xb]] }
   0xe   :  { %v83_v7 = vmul.f32 %v81_v5, %v901_v6  ;;  %v82_v8 = vmul.f32 %v81_v5, %v894_v1  ;;  %v59_v11 = vmul.f32 %v55_v2, %v912_v10  ;;  %v140_v12 = vstv %s794_s1  ;;  %s803_s20 = sld [smem:[#allocation4 + $0xd]] }
   0xf   :  { %68 = vrot.lane.b32.xlu1 %v58_v3, %s855_s27  ;;  %64 = vrot.lane.b32.xlu0 %v56_v4, %s855_s27  ;;  %v141_v13 = vmul.f32 %v140_v12, %v894_v1  ;;  %v142_v14 = vmul.f32 %v140_v12, %v901_v6  ;;  %v85_v17 = vmul.f32 %v81_v5, %v912_v10  ;;  %v180_v23 = vstv %s795_s5  ;;  %s804_s23 = sld [smem:[#allocation4 + $0xe]] }
  0x10   :  { %92 = vrot.lane.b32.xlu2 %v83_v7, %s856_s28  ;;  %v84_v18 = vmul.f32 %v81_v5, %v889_v0  ;;  %v144_v20 = vmul.f32 %v140_v12, %v889_v0  ;;  %v145_v21 = vmul.f32 %v140_v12, %v912_v10  ;;  %v143_v22 = vmul.f32 %v140_v12, %v923_v15  ;;  %s806_s29 = sld [smem:[#allocation4 + $0x10]] }
  0x11   :  { %v153_v16 = vrot.slane %v141_v13, 1  ;;  %v154_v19 = vrot.slane %v142_v14, 1  ;;  %v181_v25 = vmul.f32 %v180_v23, %v894_v1  ;;  %v182_v26 = vmul.f32 %v180_v23, %v901_v6  ;;  %s793_s30 = sld [smem:[#allocation4 + $0x3]] }
  0x12   :  { %v158_v27 = vrot.slane %v144_v20, 1  ;;  %v159_v28 = vrot.slane %v145_v21, 1  ;;  %v156_v29 = vrot.slane %v143_v22, 1  ;;  %v146_v32 = vmul.f32 %v140_v12, %v939_v30  ;;  %s44_s5 = sld [smem:[#allocation4]] }
  0x13   :  { %v155_v24 = vsel %vm120_vm0, %v153_v16, %v154_v19  ;;  %v193_v31 = vrot.slane %v181_v25, 1  ;;  %v194_v33 = vrot.slane %v182_v26, 1  ;;  %v183_v36 = vmul.f32 %v180_v23, %v923_v15  ;;  %v990_v25 = vld [vmem:[%s1250_s0 + $0x20] sm:$0xff]  ;;  %s799_s6 = sld [smem:[#allocation4 + $0x9]] }
  0x14   :  { %v160_v34 = vsel %vm120_vm0, %v158_v27, %v159_v28  ;;  %v157_v35 = vsel %vm120_vm0, %v154_v19, %v156_v29  ;;  %v184_v38 = vmul.f32 %v180_v23, %v889_v0  ;;  %v161_v39 = vrot.slane %v146_v32, 1  ;;  %v995_v27 = vld [vmem:[%s1250_s0 + $0x18] sm:$0xff]  ;;  %s805_s7 = sld [smem:[#allocation4 + $0xf]] }
  0x15   :  { %v195_v37 = vsel %vm120_vm0, %v193_v31, %v194_v33  ;;  %v185_v40 = vmul.f32 %v180_v23, %v912_v10  ;;  %v196_v41 = vrot.slane %v183_v36, 1  ;;  %v253_v42 = vstv %s797_s10  ;;  %v1014_v36 = vld [vmem:[%s1250_s0 + $0x50] sm:$0xff] }
  0x16   :  { %v198_v43 = vrot.slane %v184_v38, 1  ;;  %v162_v44 = vsel %vm120_vm0, %v159_v28, %v161_v39  ;;  %v254_v47 = vmul.f32 %v253_v42, %v894_v1  ;;  %v255_v48 = vmul.f32 %v253_v42, %v901_v6  ;;  %v1001_v28 = vld [vmem:[%s1250_s0 + $0x48] sm:$0xff] }
  0x17   :  { %90 = vrot.lane.b32.xlu1 %v82_v8, %s856_s28  ;;  %66 = vrot.lane.b32.xlu0 %v57_v9, %s855_s27  ;;  %v199_v45 = vrot.slane %v185_v40, 1  ;;  %v197_v46 = vsel %vm120_vm0, %v194_v33, %v196_v41  ;;  %v186_v49 = vmul.f32 %v180_v23, %v939_v30  ;;  %v256_v51 = vmul.f32 %v253_v42, %v923_v15  ;;  %v1025_v41 = vld [vmem:[%s1250_s0 + $0x28] sm:$0x3] }
  0x18   :  { %70 = vrot.lane.b32.xlu2 %v59_v11, %s855_s27  ;;  %v266_v52 = vrot.slane %v254_v47, 2  ;;  %v267_v53 = vrot.slane %v255_v48, 2  ;;  %v293_v55 = vstv %s798_s11  ;;  %v257_v61 = vmul.f32 %v253_v42, %v889_v0 }
  0x19   :  { %v200_v50 = vsel %vm120_vm0, %v198_v43, %v199_v45  ;;  %v201_v54 = vrot.slane %v186_v49, 1  ;;  %v269_v56 = vrot.slane %v256_v51, 2  ;;  %v294_v57 = vmul.f32 %v293_v55, %v894_v1 }
  0x1a   :  { %v295_v58 = vmul.f32 %v293_v55, %v901_v6  ;;  %v268_v59 = vsel %vm233_vm1, %v266_v52, %v267_v53  ;;  %v258_v62 = vmul.f32 %v253_v42, %v912_v10  ;;  %v296_v2 = vmul.f32 %v293_v55, %v923_v15 }
  0x1b   :  { %v202_v60 = vsel %vm120_vm0, %v199_v45, %v201_v54  ;;  %v270_v63 = vsel %vm233_vm1, %v267_v53, %v269_v56  ;;  %v306_v3 = vrot.slane %v294_v57, 2  ;;  %v271_v5 = vrot.slane %v257_v61, 2  ;;  %v1041_v56 = vld [vmem:[%s1250_s0 + $0x58] sm:$0x3]  ;;  %s807_s0 = sld [smem:[#allocation4 + $0x11]] }
  0x1c   :  { %v307_v4 = vrot.slane %v295_v58, 2  ;;  %v272_v7 = vrot.slane %v258_v62, 2  ;;  %v309_v8 = vrot.slane %v296_v2, 2  ;;  %v297_v12 = vmul.f32 %v293_v55, %v889_v0 }
  0x1d   :  { %v298_v13 = vmul.f32 %v293_v55, %v912_v10  ;;  %v259_v14 = vmul.f32 %v253_v42, %v939_v30  ;;  %v343_v26 = vstv %s800_s12  ;;  %v369_v33 = vstv %s801_s17 }
  0x1e   :  { %v308_v9 = vsel %vm233_vm1, %v306_v3, %v307_v4  ;;  %v273_v11 = vsel %vm233_vm1, %v271_v5, %v272_v7  ;;  %v310_v16 = vsel %vm233_vm1, %v307_v4, %v309_v8  ;;  %v345_v29 = vmul.f32 %v343_v26, %v990_v25 }
  0x1f   :  { %96 = vrot.lane.b32.xlu1 %v85_v17, %s856_s28  ;;  %94 = vrot.lane.b32.xlu0 %v84_v18, %s856_s28  ;;  %v299_v17 = vmul.f32 %v293_v55, %v939_v30  ;;  %v311_v18 = vrot.slane %v297_v12, 2  ;;  %v312_v19 = vrot.slane %v298_v13, 2  ;;  %v274_v20 = vrot.slane %v259_v14, 2 }
  0x20   :  { %163 = vrot.lane.b32.xlu2 %v155_v24, %s855_s27  ;;  %v344_v31 = vmul.f32 %v343_v26, %v995_v27  ;;  %v346_v32 = vmul.f32 %v343_v26, %v1001_v28  ;;  %v427_v38 = vstv %s803_s20  ;;  %v373_v43 = vmul.f32 %v369_v33, %v1014_v36 }
  0x21   :  { %v314_v21 = vrot.slane %v299_v17, 2  ;;  %v313_v22 = vsel %vm233_vm1, %v311_v18, %v312_v19  ;;  %v275_v23 = vsel %vm233_vm1, %v272_v7, %v274_v20  ;;  %v428_v39 = vmul.f32 %v427_v38, %v995_v27 }
  0x22   :  { %v429_v40 = vmul.f32 %v427_v38, %v990_v25  ;;  %v432_v47 = vmul.f32 %v427_v38, %v1014_v36  ;;  %v430_v48 = vmul.f32 %v427_v38, %v1025_v41  ;;  %v467_v49 = vstv %s804_s23 }
  0x23   :  { %v315_v24 = vsel %vm233_vm1, %v312_v19, %v314_v21  ;;  %v440_v42 = vrot.slane %v428_v39, 1  ;;  %v468_v51 = vmul.f32 %v467_v49, %v995_v27  ;;  %v469_v52 = vmul.f32 %v467_v49, %v990_v25 }
  0x24   :  { %v441_v45 = vrot.slane %v429_v40, 1  ;;  %v446_v54 = vrot.slane %v432_v47, 1  ;;  %v443_v55 = vrot.slane %v430_v48, 1  ;;  %v433_v58 = vmul.f32 %v427_v38, %v1041_v56 }
  0x25   :  { %v480_v57 = vrot.slane %v468_v51, 1  ;;  %v470_v62 = vmul.f32 %v467_v49, %v1025_v41  ;;  %v471_v2 = vmul.f32 %v467_v49, %v1001_v28  ;;  %v472_v4 = vmul.f32 %v467_v49, %v1014_v36 }
  0x26   :  { %v444_v61 = vsel %vm120_vm0, %v441_v45, %v443_v55  ;;  %v448_v3 = vrot.slane %v433_v58, 1  ;;  %v539_v7 = vstv %s806_s29  ;;  %v473_v17 = vmul.f32 %v467_v49, %v1041_v56 }
  0x27   :  { %167 = vrot.lane.b32.xlu1 %v160_v34, %s855_s27  ;;  %165 = vrot.lane.b32.xlu0 %v157_v35, %s855_s27  ;;  %v371_v34 = vmul.f32 %v369_v33, %v990_v25  ;;  %v370_v35 = vmul.f32 %v369_v33, %v995_v27  ;;  %v483_v5 = vrot.slane %v470_v62, 1  ;;  %v485_v8 = vrot.slane %v471_v2, 1 }
  0x28   :  { %203 = vrot.lane.b32.xlu2 %v195_v37, %s856_s28  ;;  %v347_v37 = vmul.f32 %v343_v26, %v1014_v36  ;;  %v486_v12 = vrot.slane %v472_v4, 1  ;;  %v540_v14 = vmul.f32 %v539_v7, %v995_v27  ;;  %v542_v19 = vmul.f32 %v539_v7, %v1025_v41 }
  0x29   :  { %v45_v58 = vstv %s44_s5 }
  0x2a   :  { %v487_v18 = vsel %vm120_vm0, %v485_v8, %v486_v12  ;;  %v552_v20 = vrot.slane %v540_v14, 2 }
  0x2f   :  { %169 = vrot.lane.b32.xlu1 %v162_v44, %s855_s27  ;;  %205 = vrot.lane.b32.xlu0 %v197_v46, %s856_s28  ;;  %v372_v44 = vmul.f32 %v369_v33, %v1001_v28  ;;  %v431_v46 = vmul.f32 %v427_v38, %v1001_v28 }
  0x30   :  { %207 = vrot.lane.b32.xlu2 %v200_v50, %s856_s28  ;;  %v442_v50 = vsel %vm120_vm0, %v440_v42, %v441_v45 }
  0x31   :  { %v445_v53 = vrot.slane %v431_v46, 1 }
  0x37   :  { %276 = vrot.lane.b32.xlu1 %v268_v59, %s855_s27  ;;  %209 = vrot.lane.b32.xlu0 %v202_v60, %s856_s28  ;;  %v481_v59 = vrot.slane %v469_v52, 1  ;;  %v447_v60 = vsel %vm120_vm0, %v445_v53, %v446_v54  ;;  %v107_v53 = vstv %s793_s30 }
  0x38   :  { %278 = vrot.lane.b32.xlu2 %v270_v63, %s855_s27  ;;  %v109_v62 = vmul.f32 %v107_v53, %v901_v6 }
  0x39   :  { %v482_v63 = vsel %vm120_vm0, %v480_v57, %v481_v59  ;;  %v484_v13 = vsel %vm120_vm0, %v481_v59, %v483_v5 }
  0x3a   :  { %v122_v8 = vrot.slane %v109_v62, 1 }
  0x3f   :  { %316 = vrot.lane.b32.xlu1 %v308_v9, %s856_s28  ;;  %280 = vrot.lane.b32.xlu0 %v273_v11, %s855_s27  ;;  %v449_v11 = vsel %vm120_vm0, %v446_v54, %v448_v3  ;;  %v46_v3 = vmul.f32 %v45_v58, %v894_v1 }
  0x40   :  { %318 = vrot.lane.b32.xlu2 %v310_v16, %s856_s28  ;;  %v541_v16 = vmul.f32 %v539_v7, %v990_v25 }
  0x42   :  { %v553_v21 = vrot.slane %v541_v16, 2 }
  0x47   :  { %320 = vrot.lane.b32.xlu1 %v313_v22, %s856_s28  ;;  %282 = vrot.lane.b32.xlu0 %v275_v23, %s855_s27  ;;  %v488_v22 = vrot.slane %v473_v17, 1  ;;  %v579_v23 = vstv %s807_s0 }
  0x48   :  { %322 = vrot.lane.b32.xlu2 %v315_v24, %s856_s28  ;;  %v555_v24 = vrot.slane %v542_v19, 2  ;;  %v582_v38 = vmul.f32 %v579_v23, %v1025_v41  ;;  %v583_v48 = vmul.f32 %v579_v23, %v1001_v28  ;;  %v584_v49 = vmul.f32 %v579_v23, %v1014_v36 }
  0x49   :  { %v489_v33 = vsel %vm120_vm0, %v486_v12, %v488_v22  ;;  %v585_v52 = vmul.f32 %v579_v23, %v1041_v56  ;;  %v47_v12 = vmul.f32 %v45_v58, %v901_v6 }
  0x4a   :  { %v597_v54 = vrot.slane %v583_v48, 2  ;;  %v598_v55 = vrot.slane %v584_v49, 2  ;;  %v113_v48 = vmul.f32 %v107_v53, %v939_v30 }
  0x4c   :  { %v599_v4 = vsel %vm233_vm1, %v597_v54, %v598_v55 }
  0x4f   :  { %354 = vrot.lane.b32.xlu1 %v345_v29, %s855_s27  ;;  %352 = vrot.lane.b32.xlu0 %v344_v31, %s855_s27  ;;  %v580_v29 = vmul.f32 %v579_v23, %v995_v27  ;;  %v581_v31 = vmul.f32 %v579_v23, %v990_v25 }
  0x50   :  { %356 = vrot.lane.b32.xlu2 %v346_v32, %s855_s27  ;;  %v554_v32 = vsel %vm233_vm1, %v552_v20, %v553_v21  ;;  %v49_v20 = vmul.f32 %v45_v58, %v912_v10 }
  0x51   :  { %v592_v39 = vrot.slane %v580_v29, 2  ;;  %v593_v40 = vrot.slane %v581_v31, 2  ;;  %v111_v29 = vmul.f32 %v107_v53, %v889_v0  ;;  %v112_v31 = vmul.f32 %v107_v53, %v912_v10 }
  0x53   :  { %v594_v46 = vsel %vm233_vm1, %v592_v39, %v593_v40 }
  0x57   :  { %380 = vrot.lane.b32.xlu1 %v371_v34, %s856_s28  ;;  %378 = vrot.lane.b32.xlu0 %v370_v35, %s856_s28  ;;  %v543_v34 = vmul.f32 %v539_v7, %v1001_v28  ;;  %v544_v35 = vmul.f32 %v539_v7, %v1014_v36 }
  0x58   :  { %358 = vrot.lane.b32.xlu2 %v347_v37, %s855_s27  ;;  %v556_v37 = vsel %vm233_vm1, %v553_v21, %v555_v24  ;;  %v48_v21 = vmul.f32 %v45_v58, %v889_v0 }
  0x59   :  { %v557_v42 = vrot.slane %v543_v34, 2 }
  0x5f   :  { %384 = vrot.lane.b32.xlu1 %v373_v43, %s856_s28  ;;  %382 = vrot.lane.b32.xlu0 %v372_v44, %s856_s28  ;;  %v558_v43 = vrot.slane %v544_v35, 2  ;;  %v595_v44 = vrot.slane %v582_v38, 2 }
  0x60   :  { %450 = vrot.lane.b32.xlu2 %v442_v50, %s855_s27  ;;  %v545_v50 = vmul.f32 %v539_v7, %v1041_v56 }
  0x61   :  { %v559_v47 = vsel %vm233_vm1, %v557_v42, %v558_v43  ;;  %v596_v51 = vsel %vm233_vm1, %v593_v40, %v595_v44  ;;  %v126_v40 = vrot.slane %v111_v29, 1  ;;  %v127_v42 = vrot.slane %v112_v31, 1 }
  0x62   :  { %v560_v57 = vrot.slane %v545_v50, 2 }
  0x64   :  { %v561_v5 = vsel %vm233_vm1, %v558_v43, %v560_v57 }
  0x67   :  { %454 = vrot.lane.b32.xlu1 %v447_v60, %s855_s27  ;;  %452 = vrot.lane.b32.xlu0 %v444_v61, %s855_s27  ;;  %v108_v61 = vmul.f32 %v107_v53, %v894_v1 }
  0x68   :  { %490 = vrot.lane.b32.xlu2 %v482_v63, %s856_s28  ;;  %v600_v63 = vrot.slane %v585_v52, 2  ;;  %v129_v52 = vrot.slane %v113_v48, 1  ;;  %v333_v48 = vstv %s799_s6 }
  0x69   :  { %v121_v7 = vrot.slane %v108_v61, 1 }
  0x6a   :  { %v1053_v9 = vpop.permute.xlu2 %92  ;;  %v130_v57 = vsel %vm120_vm0, %v127_v42, %v129_v52 }
  0x6b   :  { %v123_v14 = vsel %vm120_vm0, %v121_v7, %v122_v8 }
  0x6f   :  { %456 = vrot.lane.b32.xlu1 %v449_v11, %s855_s27  ;;  %492 = vrot.lane.b32.xlu0 %v484_v13, %s856_s28  ;;  %v601_v11 = vsel %vm233_vm1, %v598_v55, %v600_v63 }
  0x70   :  { %494 = vrot.lane.b32.xlu2 %v487_v18, %s856_s28 }
  0x72   :  { %v1065_v26 = vpop.permute.xlu2 %70 }
  0x73   :  { %v79_v34 = vadd.f32 %v1065_v26, %v49_v20 }
  0x77   :  { %562 = vrot.lane.b32.xlu1 %v554_v32, %s855_s27  ;;  %496 = vrot.lane.b32.xlu0 %v489_v33, %s856_s28  ;;  %v110_v32 = vmul.f32 %v107_v53, %v923_v15 }
  0x78   :  { %564 = vrot.lane.b32.xlu2 %v556_v37, %s855_s27 }
  0x79   :  { %v124_v43 = vrot.slane %v110_v32, 1 }
  0x7a   :  { %v164_v45 = vpop.permute.xlu2 %163 }
  0x7f   :  { %602 = vrot.lane.b32.xlu1 %v594_v46, %s856_s28  ;;  %566 = vrot.lane.b32.xlu0 %v559_v47, %s855_s27  ;;  %v128_v46 = vsel %vm120_vm0, %v126_v40, %v127_v42  ;;  %v125_v47 = vsel %vm120_vm0, %v122_v8, %v124_v43 }
  0x80   :  { %604 = vrot.lane.b32.xlu2 %v596_v51, %s856_s28 }
  0x81   :  { %v69_v59 = vpop.permute.xlu1 %68  ;;  %v65_v60 = vpop.permute.xlu0 %64 }
  0x82   :  { %v204_v2 = vpop.permute.xlu2 %203  ;;  %v76_v13 = vadd.f32 %v65_v60, %v46_v3  ;;  %v78_v35 = vadd.f32 %v69_v59, %v48_v21 }
  0x87   :  { %606 = vrot.lane.b32.xlu1 %v599_v4, %s856_s28  ;;  %568 = vrot.lane.b32.xlu0 %v561_v5, %s855_s27  ;;  %s796_s27 = sld [smem:[#allocation4 + $0x6]] }
  0x88   :  { %608 = vrot.lane.b32.xlu2 %v601_v11, %s856_s28  ;;  %s802_s28 = sld [smem:[#allocation4 + $0xc]] }
  0x89   :  { %v91_v16 = vpop.permute.xlu1 %90  ;;  %v67_v17 = vpop.permute.xlu0 %66 }
  0x8a   :  { %v102_v18 = vadd.f32 %v91_v16, %v76_v13  ;;  %v77_v19 = vadd.f32 %v67_v17, %v47_v12  ;;  %v1102_v24 = vpop.permute.xlu2 %207 }
  0x8c   :  { %v135_v22 = vadd.f32 %v123_v14, %v102_v18  ;;  %v103_v23 = vadd.f32 %v1053_v9, %v77_v19 }
  0x8d   :  { %v220_v14 = vstv %s796_s27 }
  0x8e   :  { %v175_v33 = vadd.f32 %v164_v45, %v135_v22  ;;  %v136_v45 = vadd.f32 %v125_v47, %v103_v23  ;;  %v223_v16 = vmul.f32 %v220_v14, %v923_v15  ;;  %v222_v18 = vmul.f32 %v220_v14, %v901_v6 }
  0x8f   :  { %v221_v19 = vmul.f32 %v220_v14, %v894_v1  ;;  %v225_v15 = vmul.f32 %v220_v14, %v912_v10  ;;  %v226_v6 = vmul.f32 %v220_v14, %v939_v30 }
  0x90   :  { %v215_v37 = vadd.f32 %v204_v2, %v175_v33  ;;  %v237_v22 = vrot.slane %v223_v16, 2  ;;  %v235_v23 = vrot.slane %v222_v18, 2  ;;  %v224_v33 = vmul.f32 %v220_v14, %v889_v0 }
  0x91   :  { %v97_v38 = vpop.permute.xlu1 %96  ;;  %v95_v39 = vpop.permute.xlu0 %94  ;;  %v234_v29 = vrot.slane %v221_v19, 2  ;;  %v240_v42 = vrot.slane %v225_v15, 2 }
  0x92   :  { %v105_v44 = vadd.f32 %v97_v38, %v79_v34  ;;  %v104_v9 = vadd.f32 %v95_v39, %v78_v35  ;;  %v279_v49 = vpop.permute.xlu2 %278  ;;  %v238_v32 = vsel %vm233_vm1, %v235_v23, %v237_v22  ;;  %v239_v40 = vrot.slane %v224_v33, 2 }
  0x93   :  { %v236_v34 = vsel %vm233_vm1, %v234_v29, %v235_v23  ;;  %v507_v33 = vstv %s805_s7 }
  0x94   :  { %v137_v50 = vadd.f32 %v128_v46, %v104_v9  ;;  %v138_v58 = vadd.f32 %v130_v57, %v105_v44  ;;  %v248_v43 = vadd.f32 %v236_v34, %v215_v37  ;;  %v242_v44 = vrot.slane %v226_v6, 2 }
  0x95   :  { %v395_v46 = vstv %s802_s28  ;;  %v241_v47 = vsel %vm233_vm1, %v239_v40, %v240_v42 }
  0x96   :  { %v397_v52 = vmul.f32 %v395_v46, %v990_v25  ;;  %v398_v57 = vmul.f32 %v395_v46, %v1025_v41 }
  0x98   :  { %v411_v22 = vrot.slane %v398_v57, 1  ;;  %v513_v57 = vmul.f32 %v507_v33, %v1041_v56 }
  0x99   :  { %v168_v51 = vpop.permute.xlu1 %167  ;;  %v166_v26 = vpop.permute.xlu0 %165 }
  0x9a   :  { %v177_v54 = vadd.f32 %v168_v51, %v137_v50  ;;  %v176_v55 = vadd.f32 %v166_v26, %v136_v45  ;;  %v319_v59 = vpop.permute.xlu2 %318  ;;  %v334_v45 = vmul.f32 %v333_v48, %v995_v27  ;;  %v243_v51 = vsel %vm233_vm1, %v240_v42, %v242_v44 }
  0x9b   :  { %v396_v26 = vmul.f32 %v395_v46, %v995_v27  ;;  %v508_v44 = vmul.f32 %v507_v33, %v995_v27 }
  0x9c   :  { %v217_v0 = vadd.f32 %v1102_v24, %v177_v54  ;;  %v335_v54 = vmul.f32 %v333_v48, %v990_v25 }
  0xa1   :  { %v170_v60 = vpop.permute.xlu1 %169  ;;  %v206_v61 = vpop.permute.xlu0 %205 }
  0xa2   :  { %v178_v62 = vadd.f32 %v170_v60, %v138_v58  ;;  %v1112_v3 = vpop.permute.xlu2 %322  ;;  %v216_v31 = vadd.f32 %v206_v61, %v176_v55 }
  0xa4   :  { %v249_v38 = vadd.f32 %v238_v32, %v216_v31  ;;  %v399_v31 = vmul.f32 %v395_v46, %v1001_v28 }
  0xa6   :  { %v289_v9 = vadd.f32 %v279_v49, %v249_v38  ;;  %v250_v49 = vadd.f32 %v241_v47, %v217_v0  ;;  %v509_v38 = vmul.f32 %v507_v33, %v990_v25  ;;  %v413_v40 = vrot.slane %v399_v31, 1 }
  0xa8   :  { %v329_v24 = vadd.f32 %v319_v59, %v289_v9 }
  0xa9   :  { %v277_v63 = vpop.permute.xlu1 %276  ;;  %v210_v2 = vpop.permute.xlu0 %209 }
  0xaa   :  { %v1114_v5 = vpop.permute.xlu2 %356  ;;  %v288_v10 = vadd.f32 %v277_v63, %v248_v43  ;;  %v218_v30 = vadd.f32 %v210_v2, %v178_v62  ;;  %v336_v63 = vmul.f32 %v333_v48, %v1001_v28  ;;  %v408_v2 = vrot.slane %v396_v26, 1 }
  0xab   :  { %v339_v18 = vadd.f32 %v335_v54, %v329_v24  ;;  %v401_v43 = vmul.f32 %v395_v46, %v1041_v56  ;;  %v512_v24 = vmul.f32 %v507_v33, %v1014_v36 }
  0xac   :  { %v251_v60 = vadd.f32 %v243_v51, %v218_v30 }
  0xad   :  { %v416_v25 = vrot.slane %v401_v43, 1 }
  0xb1   :  { %v317_v53 = vpop.permute.xlu1 %316  ;;  %v281_v4 = vpop.permute.xlu0 %280 }
  0xb2   :  { %v1116_v11 = vpop.permute.xlu2 %358  ;;  %v328_v50 = vadd.f32 %v317_v53, %v288_v10  ;;  %v290_v58 = vadd.f32 %v281_v4, %v250_v49  ;;  %v409_v53 = vrot.slane %v397_v52, 1  ;;  %v400_v4 = vmul.f32 %v395_v46, %v1014_v36 }
  0xb3   :  { %v511_v52 = vmul.f32 %v507_v33, %v1001_v28 }
  0xb4   :  { %v338_v61 = vadd.f32 %v334_v45, %v328_v50  ;;  %v410_v29 = vsel %vm120_vm0, %v408_v2, %v409_v53  ;;  %v414_v42 = vrot.slane %v400_v4, 1  ;;  %v521_v50 = vrot.slane %v509_v38, 2 }
  0xb5   :  { %v520_v45 = vrot.slane %v508_v44, 2 }
  0xb6   :  { %v415_v30 = vsel %vm120_vm0, %v413_v40, %v414_v42  ;;  %v417_v49 = vsel %vm120_vm0, %v414_v42, %v416_v25  ;;  %v857_v40 = vmov 512.0  }
  0xb7   :  { %v522_v54 = vsel %vm233_vm1, %v520_v45, %v521_v50  ;;  %820 = vrcp.f32 %v857_v40 }
  0xb9   :  { %v321_v7 = vpop.permute.xlu1 %320  ;;  %v283_v8 = vpop.permute.xlu0 %282 }
  0xba   :  { %v1119_v17 = vpop.permute.xlu2 %450  ;;  %v330_v14 = vadd.f32 %v321_v7, %v290_v58  ;;  %v291_v16 = vadd.f32 %v283_v8, %v251_v60  ;;  %v337_v7 = vmul.f32 %v333_v48, %v1014_v36  ;;  %v525_v60 = vrot.slane %v511_v52, 2 }
  0xbc   :  { %v340_v34 = vadd.f32 %v336_v63, %v330_v14  ;;  %v331_v6 = vadd.f32 %v1112_v3, %v291_v16 }
  0xbd   :  { %v821_v42 = vpop.eup %820 }
  0xbe   :  { %v341_v0 = vadd.f32 %v337_v7, %v331_v6  ;;  %v366_v3 = vadd.f32 %v1114_v5, %v340_v34  ;;  %v636_v43 = vmul.f32 512.0, %v821_v42  ;;  %vm640_vm3 = vweird.f32 %v821_v42 }
  0xc0   :  { %v367_v27 = vadd.f32 %v1116_v11, %v341_v0  ;;  %v637_v44 = vsub.f32 1.0, %v636_v43 }
  0xc1   :  { %v355_v12 = vpop.permute.xlu1 %354  ;;  %v353_v13 = vpop.permute.xlu0 %352 }
  0xc2   :  { %v1134_v39 = vpop.permute.xlu2 %490  ;;  %v364_v19 = vadd.f32 %v353_v13, %v338_v61  ;;  %v365_v59 = vadd.f32 %v355_v12, %v339_v18  ;;  %v412_v13 = vsel %vm120_vm0, %v409_v53, %v411_v22  ;;  %v510_v12 = vmul.f32 %v507_v33, %v1025_v41 }
  0xc3   :  { %v526_v61 = vrot.slane %v512_v24, 2 }
  0xc4   :  { %v523_v47 = vrot.slane %v510_v12, 2 }
  0xc6   :  { %v524_v5 = vsel %vm233_vm1, %v521_v50, %v523_v47 }
  0xc9   :  { %v1123_v20 = vpop.permute.xlu1 %380  ;;  %v379_v21 = vpop.permute.xlu0 %378 }
  0xca   :  { %v1146_v62 = vpop.permute.xlu2 %494  ;;  %v390_v23 = vadd.f32 %v379_v21, %v364_v19  ;;  %v391_v8 = vadd.f32 %v1123_v20, %v365_v59  ;;  %v527_v19 = vsel %vm233_vm1, %v525_v60, %v526_v61 }
  0xcc   :  { %v422_v21 = vadd.f32 %v410_v29, %v390_v23  ;;  %v423_v9 = vadd.f32 %v412_v13, %v391_v8 }
  0xce   :  { %v462_v20 = vadd.f32 %v1119_v17, %v422_v21 }
  0xd0   :  { %v502_v17 = vadd.f32 %v1134_v39, %v462_v20  ;;  %v528_v39 = vrot.slane %v513_v57, 2 }
  0xd1   :  { %v1130_v1 = vpop.permute.xlu1 %384  ;;  %v1132_v35 = vpop.permute.xlu0 %382 }
  0xd2   :  { %v565_v10 = vpop.permute.xlu2 %564  ;;  %v392_v48 = vadd.f32 %v1132_v35, %v366_v3  ;;  %v393_v35 = vadd.f32 %v1130_v1, %v367_v27  ;;  %v534_v2 = vadd.f32 %v522_v54, %v502_v17 }
  0xd4   :  { %v425_v63 = vadd.f32 %v417_v49, %v393_v35 }
  0xd9   :  { %v1142_v37 = vpop.permute.xlu1 %454  ;;  %v453_v55 = vpop.permute.xlu0 %452 }
  0xda   :  { %v463_v41 = vadd.f32 %v453_v55, %v423_v9  ;;  %v424_v55 = vadd.f32 %v415_v30, %v392_v48  ;;  %v605_v28 = vpop.permute.xlu2 %604 }
  0xdc   :  { %v464_v11 = vadd.f32 %v1142_v37, %v424_v55  ;;  %v529_v37 = vsel %vm233_vm1, %v526_v61, %v528_v39 }
  0xde   :  { %v504_v1 = vadd.f32 %v1146_v62, %v464_v11 }
  0xe0   :  { %v536_v23 = vadd.f32 %v527_v19, %v504_v1 }
  0xe1   :  { %v457_v32 = vpop.permute.xlu1 %456  ;;  %v493_v15 = vpop.permute.xlu0 %492 }
  0xe2   :  { %v503_v26 = vadd.f32 %v493_v15, %v463_v41  ;;  %v465_v14 = vadd.f32 %v457_v32, %v425_v63  ;;  %v609_v62 = vpop.permute.xlu2 %608 }
  0xe4   :  { %v535_v58 = vadd.f32 %v524_v5, %v503_v26 }
  0xe6   :  { %v575_v16 = vadd.f32 %v565_v10, %v535_v58  ;;  %v638_v10 = vmul.f32 %v821_v42, %v637_v44 }
  0xe8   :  { %v1179_v59 = vadd.f32 %v605_v28, %v575_v16  ;;  %v639_v48 = vadd.f32 %v821_v42, %v638_v10 }
  0xe9   :  { %v563_v51 = vpop.permute.xlu1 %562  ;;  %v497_v46 = vpop.permute.xlu0 %496 }
  0xea   :  { %v574_v18 = vadd.f32 %v563_v51, %v534_v2  ;;  %v505_v22 = vadd.f32 %v497_v46, %v465_v14  ;;  %v620_v15 = vsel %vm618_vm2, %v1179_v59, 0.0  ;;  %v641_v25 = vsel %vm640_vm3, %v821_v42, %v639_v48 }
  0xec   :  { %v537_v4 = vadd.f32 %v529_v37, %v505_v22 }
  0xf1   :  { %v603_v36 = vpop.permute.xlu1 %602  ;;  %v567_v53 = vpop.permute.xlu0 %566 }
  0xf2   :  { %v1176_v56 = vadd.f32 %v603_v36, %v574_v18  ;;  %v576_v31 = vadd.f32 %v567_v53, %v536_v23 }
  0xf4   :  { %v619_v29 = vsel %vm618_vm2, %v1176_v56, 0.0 }
  0xf5   :  { %v621_v7 = vadd.f32 %v620_v15, %v619_v29 }
  0xf9   :  { %v607_v32 = vpop.permute.xlu1 %606  ;;  %v569_v33 = vpop.permute.xlu0 %568 }
  0xfa   :  { %v1185_v34 = vadd.f32 %v607_v32, %v576_v31  ;;  %v577_v6 = vadd.f32 %v569_v33, %v537_v4 }
  0xfc   :  { %v1187_v8 = vadd.f32 %v609_v62, %v577_v6  ;;  %v622_v13 = vsel %vm618_vm2, %v1185_v34, 0.0 }
  0xfd   :  { %v623_v12 = vadd.f32 %v622_v13, %v621_v7 }
  0xfe   :  { %v624_v21 = vsel %vm618_vm2, %v1187_v8, 0.0 }
  0xff   :  { %v625_v38 = vadd.f32 %v624_v21, %v623_v12 }
 0x101   :  { %626 = vadd.xlane.f32.xlu0 %v625_v38 }
 0x174   :  { %v627_v0 = vpop.xlane.xlu0 %626 }
 0x175   :  { %v628_v3 = vrot.slane %v627_v0, 4 }
 0x177   :  { %v629_v9 = vadd.f32 %v628_v3, %v627_v0 }
 0x179   :  { %v630_v47 = vrot.slane %v629_v9, 2 }
 0x17b   :  { %v631_v20 = vadd.f32 %v630_v47, %v629_v9 }
 0x17d   :  { %v632_v41 = vrot.slane %v631_v20, 1 }
 0x17f   :  { %v633_v30 = vadd.f32 %v632_v41, %v631_v20 }
 0x181   :  { %808 = vpush %v633_v30 }
 0x182   :  { %810 = vpush %v641_v25 }
 0x1b2   :  { %s809_s8 = spop %808 }
 0x1b3   :  { %s1193_s9 = spop %810 }
 0x1b4   :  { %s1196_s10 = smul.f32 %s1193_s9, %s809_s8 }
 0x1b6   :  { %v644_v50 = vstv %s1196_s10 }
 0x1b7   :  { %v645_v45 = vsub.f32 %v1176_v56, %v644_v50  ;;  %v646_v51 = vsub.f32 %v1179_v59, %v644_v50  ;;  %v647_v46 = vsub.f32 %v1185_v34, %v644_v50  ;;  %v648_v27 = vsub.f32 %v1187_v8, %v644_v50 }
 0x1b9   :  { %v649_v26 = vmul.f32 %v645_v45, %v645_v45  ;;  %v650_v5 = vmul.f32 %v646_v51, %v646_v51  ;;  %v651_v52 = vmul.f32 %v647_v46, %v647_v46  ;;  %v652_v24 = vmul.f32 %v648_v27, %v648_v27 }
 0x1bb   :  { %v653_v17 = vsel %vm618_vm2, %v649_v26, 0.0  ;;  %v654_v35 = vsel %vm618_vm2, %v650_v5, 0.0  ;;  %v656_v49 = vsel %vm618_vm2, %v651_v52, 0.0  ;;  %v658_v57 = vsel %vm618_vm2, %v652_v24, 0.0 }
 0x1bc   :  { %v655_v55 = vadd.f32 %v654_v35, %v653_v17 }
 0x1be   :  { %v657_v54 = vadd.f32 %v656_v49, %v655_v55 }
 0x1c0   :  { %v659_v11 = vadd.f32 %v658_v57, %v657_v54 }
 0x1c2   :  { %660 = vadd.xlane.f32.xlu1 %v659_v11 }
 0x235   :  { %v661_v58 = vpop.xlane.xlu1 %660 }
 0x236   :  { %v662_v60 = vrot.slane %v661_v58, 4 }
 0x238   :  { %v663_v61 = vadd.f32 %v662_v60, %v661_v58 }
 0x23a   :  { %v664_v63 = vrot.slane %v663_v61, 2 }
 0x23c   :  { %v665_v28 = vadd.f32 %v664_v63, %v663_v61 }
 0x23e   :  { %v666_v2 = vrot.slane %v665_v28, 1 }
 0x240   :  { %v667_v36 = vadd.f32 %v666_v2, %v665_v28 }
 0x242   :  { %812 = vpush %v667_v36 }
 0x273   :  { %s813_s11 = spop %812 }
 0x274   :  { %s677_s12 = smul.f32 %s813_s11, %s1193_s9 }
 0x276   :  { %s679_s13 = sadd.f32 1e-05, %s677_s12 }
 0x278   :  { %v680_v53 = vstv %s679_s13 }
 0x279   :  { %822 = vrsqrt.f32 %v680_v53  ;;  %vm687_vm5 = vweird.f32 %v680_v53 }
 0x27f   :  { %v823_v39 = vpop.eup %822 }
 0x280   :  { %v682_v1 = vmul.f32 %v823_v39, %v680_v53  ;;  %vm688_vm4 = vweird.f32 %v823_v39 }
 0x281   :  { %vm689_vm6 = vmor %vm687_vm5, %vm688_vm4 }
 0x282   :  { %v683_v14 = vmul.f32 %v823_v39, %v682_v1 }
 0x284   :  { %v684_v16 = vmul.f32 0.5, %v683_v14 }
 0x286   :  { %v685_v18 = vsub.f32 1.5, %v684_v16 }
 0x288   :  { %v686_v19 = vmul.f32 %v823_v39, %v685_v18 }
 0x28a   :  { %v690_v22 = vsel %vm689_vm6, %v823_v39, %v686_v19 }
 0x28b   :  { %814 = vpush %v690_v22 }
 0x2bc   :  { %s815_s14 = spop %814 }
 0x2bd   :  { %s692_s17 = smul.f32 %s815_s14, %s1252_s2 }
 0x2bf   :  { %s694_s18 = smul.f32 %s692_s17, %s1196_s10  ;;  %v696_v37 = vstv %s692_s17 }
 0x2c0   :  { %v697_v23 = vmul.f32 %v696_v37, %v1176_v56  ;;  %v698_v29 = vmul.f32 %v696_v37, %v1179_v59  ;;  %v699_v31 = vmul.f32 %v696_v37, %v1185_v34  ;;  %v700_v4 = vmul.f32 %v696_v37, %v1187_v8 }
 0x2c1   :  { %s695_s21 = ssub.f32 %s1253_s3, %s694_s18 }
 0x2c3   :  { %v701_v62 = vstv %s695_s21 }
 0x2c4   :  { %v702_v32 = vadd.f32 %v701_v62, %v697_v23  ;;  %v703_v33 = vadd.f32 %v701_v62, %v698_v29  ;;  %v704_v15 = vadd.f32 %v701_v62, %v699_v31  ;;  %v705_v6 = vadd.f32 %v701_v62, %v700_v4 }
 0x2c6   :  { %v706_v7 = vsub.f32 0.0, %v702_v32  ;;  %v707_v13 = vsub.f32 0.0, %v703_v33  ;;  %v708_v12 = vsub.f32 0.0, %v704_v15  ;;  %v709_v21 = vsub.f32 0.0, %v705_v6 }
 0x2c8   :  { %v710_v38 = vmul.f32 1.442695, %v706_v7  ;;  %v712_v40 = vmul.f32 1.442695, %v707_v13  ;;  %v714_v42 = vmul.f32 1.442695, %v708_v12 }
 0x2c9   :  { %v716_v43 = vmul.f32 1.442695, %v709_v21 }
 0x2ca   :  { %824 = vpow2.f32 %v710_v38 }
 0x2cb   :  { %826 = vpow2.f32 %v712_v40 }
 0x2cc   :  { %828 = vpow2.f32 %v714_v42 }
 0x2cd   :  { %830 = vpow2.f32 %v716_v43 }
 0x2d0   :  { %v825_v56 = vpop.eup %824 }
 0x2d1   :  { %v827_v59 = vpop.eup %826  ;;  %v718_v34 = vadd.f32 1.0, %v825_v56 }
 0x2d2   :  { %v829_v8 = vpop.eup %828  ;;  %v719_v44 = vadd.f32 1.0, %v827_v59 }
 0x2d3   :  { %v831_v0 = vpop.eup %830  ;;  %v720_v3 = vadd.f32 1.0, %v829_v8  ;;  %832 = vrcp.f32 %v718_v34  ;;  %v731_v10 = vand.u32 2147483647, %v718_v34  ;;  %v733_v20 = vand.u32 2147483648, %v718_v34 }
 0x2d4   :  { %v721_v9 = vadd.f32 1.0, %v831_v0  ;;  %834 = vrcp.f32 %v719_v44  ;;  %vm727_vm7 = vweird.f32 %v718_v34  ;;  %vm742_vm8 = vweird.f32 %v719_v44 }
 0x2d5   :  { %836 = vrcp.f32 %v720_v3  ;;  %v746_v50 = vand.u32 2147483647, %v719_v44  ;;  %vm1219_vm9 = vcmp.eq.f32.partialorder %v731_v10, 8.507059e+37  ;;  %v748_v46 = vand.u32 2147483648, %v719_v44 }
 0x2d6   :  { %838 = vrcp.f32 %v721_v9  ;;  %v734_v5 = vor.u32 1.1754944e-38, %v733_v20  ;;  %vm757_vm10 = vweird.f32 %v720_v3  ;;  %v761_v24 = vand.u32 2147483647, %v720_v3 }
 0x2d7   :  { %vm1223_vm13 = vcmp.eq.f32.partialorder %v746_v50, 8.507059e+37  ;;  %v763_v57 = vand.u32 2147483648, %v720_v3  ;;  %v749_v63 = vor.u32 1.1754944e-38, %v748_v46  ;;  %v776_v28 = vand.u32 2147483647, %v721_v9 }
 0x2d8   :  { %v778_v2 = vand.u32 2147483648, %v721_v9  ;;  %vm772_vm4 = vweird.f32 %v721_v9  ;;  %vm762_vm5 = vcmp.eq.f32.partialorder %v761_v24, 8.507059e+37 }
 0x2d9   :  { %v833_v47 = vpop.eup %832  ;;  %v764_v16 = vor.u32 1.1754944e-38, %v763_v57 }
 0x2da   :  { %v835_v48 = vpop.eup %834  ;;  %v723_v41 = vmul.f32 %v833_v47, %v718_v34  ;;  %vm728_vm11 = vweird.f32 %v833_v47  ;;  %v779_v23 = vor.u32 1.1754944e-38, %v778_v2 }
 0x2db   :  { %v837_v30 = vpop.eup %836  ;;  %v738_v25 = vmul.f32 %v835_v48, %v719_v44  ;;  %vm743_vm12 = vweird.f32 %v835_v48  ;;  %vm729_vm15 = vmor %vm727_vm7, %vm728_vm11  ;;  %vm777_vm7 = vcmp.eq.f32.partialorder %v776_v28, 8.507059e+37 }
 0x2dc   :  { %v724_v45 = vsub.f32 1.0, %v723_v41  ;;  %v753_v27 = vmul.f32 %v837_v30, %v720_v3  ;;  %v839_v26 = vpop.eup %838  ;;  %vm758_vm14 = vweird.f32 %v837_v30  ;;  %vm744_vm0 = vmor %vm742_vm8, %vm743_vm12 }
 0x2dd   :  { %v739_v52 = vsub.f32 1.0, %v738_v25  ;;  %v768_v55 = vmul.f32 %v839_v26, %v721_v9  ;;  %vm773_vm1 = vweird.f32 %v839_v26  ;;  %vm759_vm3 = vmor %vm757_vm10, %vm758_vm14 }
 0x2de   :  { %v725_v17 = vmul.f32 %v833_v47, %v724_v45  ;;  %v754_v35 = vsub.f32 1.0, %v753_v27  ;;  %vm774_vm6 = vmor %vm772_vm4, %vm773_vm1 }
 0x2df   :  { %v740_v49 = vmul.f32 %v835_v48, %v739_v52  ;;  %v769_v60 = vsub.f32 1.0, %v768_v55 }
 0x2e0   :  { %v726_v11 = vadd.f32 %v833_v47, %v725_v17  ;;  %v755_v58 = vmul.f32 %v837_v30, %v754_v35 }
 0x2e1   :  { %v741_v61 = vadd.f32 %v835_v48, %v740_v49  ;;  %v770_v39 = vmul.f32 %v839_v26, %v769_v60 }
 0x2e2   :  { %v730_v36 = vsel %vm729_vm15, %v833_v47, %v726_v11  ;;  %v756_v53 = vadd.f32 %v837_v30, %v755_v58 }
 0x2e3   :  { %v735_v1 = vsel %vm1219_vm9, %v734_v5, %v730_v36  ;;  %v745_v14 = vsel %vm744_vm0, %v835_v48, %v741_v61  ;;  %v771_v22 = vadd.f32 %v839_v26, %v770_v39 }
 0x2e4   :  { %v750_v18 = vsel %vm1223_vm13, %v749_v63, %v745_v14  ;;  %v760_v19 = vsel %vm759_vm3, %v837_v30, %v756_v53  ;;  %782 = vst.msk [vmem:[%s1254_s4] sm:$0xff] %vm618_vm2, %v735_v1 }
 0x2e5   :  { %v765_v37 = vsel %vm762_vm5, %v764_v16, %v760_v19  ;;  %783 = vst.msk [vmem:[%s1254_s4 + $0x8] sm:$0xff] %vm618_vm2, %v750_v18  ;;  %v775_v29 = vsel %vm774_vm6, %v839_v26, %v771_v22 }
 0x2e6   :  { %784 = vst.msk [vmem:[%s1254_s4 + $0x10] sm:$0xff] %vm618_vm2, %v765_v37  ;;  %v780_v31 = vsel %vm777_vm7, %v779_v23, %v775_v29 }
 0x2e7   :  { %785 = vst.msk [vmem:[%s1254_s4 + $0x18] sm:$0xff] %vm618_vm2, %v780_v31 }
 0x2e8   :  { %790 = vsyncpa [#allocation5], 1 }

</bundles_post_ra>
